<compile_context>
chip_gen: v6e
topology: v6e:2x2x1
jax: 0.10.0
libtpu: 0.0.40
codegen_flags: <defaults>
</compile_context>

<pallas_src>
import jax
import jax.numpy as jnp
from jax.experimental import pallas as pl
from jax.experimental.pallas import tpu as pltpu

EPS = 1e-5
DIM = 256


def _bn_relu(y, gamma, beta, inv_b):
    # BatchNorm1d training mode (biased batch variance) + affine + ReLU.
    # Single pass over y: sum and sum-of-squares; inv_std folded into gamma
    # so the per-element scale stays a (1, DIM) vector.
    s1 = jnp.sum(y, axis=0, keepdims=True)
    s2 = jnp.sum(y * y, axis=0, keepdims=True)
    mean = s1 * inv_b
    var = jnp.maximum(s2 * inv_b - mean * mean, 0.0)
    scale = gamma * jax.lax.rsqrt(var + EPS)
    return jnp.maximum((y - mean) * scale + beta, 0.0)


def feature_generator_kernel(x_ref, w1_ref, w2_ref, w3_ref, w4_ref, b4_ref,
                             g_ref, bt_ref, o_ref):
    # Valid only while the full batch is a single block (no batch grid).
    inv_b = jnp.float32(1.0 / x_ref.shape[0])

    # x arrives as bf16; MXU accumulates in f32.  Linear biases b1/b2/b3 are
    # intentionally omitted (cancelled by the BN mean subtraction).
    h = jnp.dot(x_ref[...], w1_ref[...], preferred_element_type=jnp.float32)
    h = _bn_relu(h, g_ref[0:1, :], bt_ref[0:1, :], inv_b)

    h = jnp.dot(h.astype(jnp.bfloat16), w2_ref[...],
                preferred_element_type=jnp.float32)
    h = _bn_relu(h, g_ref[1:2, :], bt_ref[1:2, :], inv_b)

    h = jnp.dot(h.astype(jnp.bfloat16), w3_ref[...],
                preferred_element_type=jnp.float32)
    h = _bn_relu(h, g_ref[2:3, :], bt_ref[2:3, :], inv_b)

    h = jnp.dot(h.astype(jnp.bfloat16), w4_ref[...],
                preferred_element_type=jnp.float32)
    o_ref[...] = jnp.maximum(h + b4_ref[...], 0.0).astype(o_ref.dtype)


def prepare_params(params):
    """One-time conversion: bf16 MXU weights, stacked BN gamma/beta.

    Do this ONCE and reuse the result across calls — rebuilding it per call
    was the dominant cost at small batch sizes.
    """
    return dict(
        w1=params["w1"].astype(jnp.bfloat16),
        w2=params["w2"].astype(jnp.bfloat16),
        w3=params["w3"].astype(jnp.bfloat16),
        w4=params["w4"].astype(jnp.bfloat16),
        b4=params["b4"].astype(jnp.float32),                       # (1, out)
        gamma=jnp.concatenate(
            [params["g1"], params["g2"], params["g3"]], axis=0),   # (3, DIM)
        beta=jnp.concatenate(
            [params["beta1"], params["beta2"], params["beta3"]], axis=0),
    )


@jax.jit
def feature_generator(noise, prepped):
    """noise: (B, noise_size) f32 or bf16; prepped: output of prepare_params."""
    B, noise_size = noise.shape
    out_size = prepped["w4"].shape[1]

    x = noise.astype(jnp.bfloat16)  # no-op if the caller already passes bf16

    vmem = pl.BlockSpec(memory_space=pltpu.MemorySpace.VMEM)
    args = (x, prepped["w1"], prepped["w2"], prepped["w3"], prepped["w4"],
            prepped["b4"], prepped["gamma"], prepped["beta"])

    flops = 2 * B * (noise_size * DIM + DIM * DIM + DIM * DIM + DIM * out_size)
    bytes_accessed = (sum(a.size * a.dtype.itemsize for a in args)
                      + B * out_size * 4)

    return pl.pallas_call(
        feature_generator_kernel,
        out_shape=jax.ShapeDtypeStruct((B, out_size), jnp.float32),
        in_specs=[vmem] * len(args),
        out_specs=vmem,
        cost_estimate=pl.CostEstimate(
            flops=flops, transcendentals=3 * DIM,
            bytes_accessed=bytes_accessed),
    )(*args)


def init_params(key, noise_size, output_size, dim=DIM):
    ks = jax.random.split(key, 14)

    def linear(kw, kb, fan_in, fan_out):
        # PyTorch-like init, stored (in, out).  Biases deliberately nonzero so
        # the b1/b2/b3-cancellation claim is actually exercised.
        w = jax.random.normal(kw, (fan_in, fan_out), jnp.float32) * 0.01
        b = jax.random.normal(kb, (1, fan_out), jnp.float32) * 0.01
        return w, b

    w1, b1 = linear(ks[0], ks[1], noise_size, dim)
    w2, b2 = linear(ks[2], ks[3], dim, dim)
    w3, b3 = linear(ks[4], ks[5], dim, dim)
    w4, b4 = linear(ks[6], ks[7], dim, output_size)
    # BN affine params: init is gamma=1, beta=0; perturb them so the general
    # (trained) path is tested rather than the trivial identity.
    g1 = 1.0 + 0.1 * jax.random.normal(ks[8], (1, dim), jnp.float32)
    g2 = 1.0 + 0.1 * jax.random.normal(ks[9], (1, dim), jnp.float32)
    g3 = 1.0 + 0.1 * jax.random.normal(ks[10], (1, dim), jnp.float32)
    beta1 = 0.1 * jax.random.normal(ks[11], (1, dim), jnp.float32)
    beta2 = 0.1 * jax.random.normal(ks[12], (1, dim), jnp.float32)
    beta3 = 0.1 * jax.random.normal(ks[13], (1, dim), jnp.float32)
    return dict(w1=w1, b1=b1, w2=w2, b2=b2, w3=w3, b3=b3, w4=w4, b4=b4,
                g1=g1, g2=g2, g3=g3, beta1=beta1, beta2=beta2, beta3=beta3)


def reference(noise, p):
    # Pure-JAX f32 reference matching PyTorch training-mode semantics
    # (Linear biases included; BatchNorm1d: biased batch variance, eps inside
    # rsqrt, affine gamma/beta applied).
    def bn_relu(y, g, b):
        mean = jnp.mean(y, axis=0, keepdims=True)
        var = jnp.mean((y - mean) * (y - mean), axis=0, keepdims=True)
        return jnp.maximum((y - mean) * jax.lax.rsqrt(var + EPS) * g + b, 0.0)

    h = bn_relu(noise @ p["w1"] + p["b1"], p["g1"], p["beta1"])
    h = bn_relu(h @ p["w2"] + p["b2"], p["g2"], p["beta2"])
    h = bn_relu(h @ p["w3"] + p["b3"], p["g3"], p["beta3"])
    h = h @ p["w4"] + p["b4"]
    return jnp.maximum(h, 0.0)


if __name__ == "__main__":
    B, NOISE_SIZE, OUTPUT_SIZE = 8, 32, 64
    key = jax.random.PRNGKey(0)
    k_noise, k_params = jax.random.split(key)

    noise = jax.random.normal(k_noise, (B, NOISE_SIZE), jnp.float32)
    params = init_params(k_params, NOISE_SIZE, OUTPUT_SIZE)

    # One-time preprocessing (hoisted out of the per-call path).
    prepped = prepare_params(params)
    noise_bf16 = noise.astype(jnp.bfloat16)   # cast where the input is produced

    out = feature_generator(noise_bf16, prepped)
    out = jax.block_until_ready(out)

    ref = reference(noise, params)
    assert out.shape == (B, OUTPUT_SIZE)
    # Tolerance reflects bf16 matmul operands (f32 accumulate) in the kernel.
    assert jnp.allclose(out, ref, atol=5e-2, rtol=5e-2)
    print("KERNEL_OK")
</pallas_src>

<mosaic_0001>
module attributes {stable_mosaic.version = 11 : i64} {
  func.func @feature_generator_kernel(%arg0: memref<8x32xbf16, #tpu.memory_space<vmem>>, %arg1: memref<32x256xbf16, #tpu.memory_space<vmem>>, %arg2: memref<256x256xbf16, #tpu.memory_space<vmem>>, %arg3: memref<256x256xbf16, #tpu.memory_space<vmem>>, %arg4: memref<256x64xbf16, #tpu.memory_space<vmem>>, %arg5: memref<1x64xf32, #tpu.memory_space<vmem>>, %arg6: memref<3x256xf32, #tpu.memory_space<vmem>>, %arg7: memref<3x256xf32, #tpu.memory_space<vmem>>, %arg8: memref<8x64xf32, #tpu.memory_space<vmem>>) attributes {dimension_semantics = [], scalar_prefetch = 0 : i64, scratch_operands = 0 : i64, tpu.core_type = #tpu.core_type<tc>} {
    %c0 = arith.constant 0 : index
    %c0_0 = arith.constant 0 : index
    %0 = vector.load %arg0[%c0, %c0_0] : memref<8x32xbf16, #tpu.memory_space<vmem>>, vector<8x32xbf16>
    %c0_1 = arith.constant 0 : index
    %c0_2 = arith.constant 0 : index
    %1 = vector.load %arg1[%c0_1, %c0_2] : memref<32x256xbf16, #tpu.memory_space<vmem>>, vector<32x256xbf16>
    %cst = arith.constant dense<0.000000e+00> : vector<8x256xf32>
    %2 = tpu.matmul %0, %1, %cst {dimension_numbers = #tpu.dot_dimension_numbers<[1], [0], [0], [1], [0, 0, 1, 1], [], []>} : vector<8x32xbf16>, vector<32x256xbf16>, vector<8x256xf32> -> vector<8x256xf32>
    %c0_3 = arith.constant 0 : index
    %c0_4 = arith.constant 0 : index
    %3 = vector.load %arg6[%c0_3, %c0_4] : memref<3x256xf32, #tpu.memory_space<vmem>>, vector<1x256xf32>
    %c0_5 = arith.constant 0 : index
    %c0_6 = arith.constant 0 : index
    %4 = vector.load %arg7[%c0_5, %c0_6] : memref<3x256xf32, #tpu.memory_space<vmem>>, vector<1x256xf32>
    %cst_7 = arith.constant dense<0.000000e+00> : vector<256xf32>
    %5 = vector.multi_reduction <add>, %2, %cst_7 [0] : vector<8x256xf32> to vector<256xf32>
    %6 = vector.shape_cast %5 : vector<256xf32> to vector<1x256xf32>
    %7 = arith.mulf %2, %2 : vector<8x256xf32>
    %cst_8 = arith.constant dense<0.000000e+00> : vector<256xf32>
    %8 = vector.multi_reduction <add>, %7, %cst_8 [0] : vector<8x256xf32> to vector<256xf32>
    %9 = vector.shape_cast %8 : vector<256xf32> to vector<1x256xf32>
    %cst_9 = arith.constant 1.250000e-01 : f32
    %10 = vector.broadcast %cst_9 : f32 to vector<1x256xf32>
    %11 = arith.mulf %6, %10 : vector<1x256xf32>
    %cst_10 = arith.constant 1.250000e-01 : f32
    %12 = vector.broadcast %cst_10 : f32 to vector<1x256xf32>
    %13 = arith.mulf %9, %12 : vector<1x256xf32>
    %14 = arith.mulf %11, %11 : vector<1x256xf32>
    %15 = arith.subf %13, %14 : vector<1x256xf32>
    %cst_11 = arith.constant 0.000000e+00 : f32
    %16 = vector.broadcast %cst_11 : f32 to vector<1x256xf32>
    %17 = arith.maximumf %15, %16 : vector<1x256xf32>
    %cst_12 = arith.constant 9.99999974E-6 : f32
    %18 = vector.broadcast %cst_12 : f32 to vector<1x256xf32>
    %19 = arith.addf %17, %18 : vector<1x256xf32>
    %20 = math.rsqrt %19 : vector<1x256xf32>
    %21 = arith.mulf %3, %20 : vector<1x256xf32>
    %22 = vector.broadcast %11 : vector<1x256xf32> to vector<8x256xf32>
    %23 = arith.subf %2, %22 : vector<8x256xf32>
    %24 = vector.broadcast %21 : vector<1x256xf32> to vector<8x256xf32>
    %25 = arith.mulf %23, %24 : vector<8x256xf32>
    %26 = vector.broadcast %4 : vector<1x256xf32> to vector<8x256xf32>
    %27 = arith.addf %25, %26 : vector<8x256xf32>
    %cst_13 = arith.constant 0.000000e+00 : f32
    %28 = vector.broadcast %cst_13 : f32 to vector<8x256xf32>
    %29 = arith.maximumf %27, %28 : vector<8x256xf32>
    %30 = arith.truncf %29 : vector<8x256xf32> to vector<8x256xbf16>
    %c0_14 = arith.constant 0 : index
    %c0_15 = arith.constant 0 : index
    %31 = vector.load %arg2[%c0_14, %c0_15] : memref<256x256xbf16, #tpu.memory_space<vmem>>, vector<256x256xbf16>
    %cst_16 = arith.constant dense<0.000000e+00> : vector<8x256xf32>
    %32 = tpu.matmul %30, %31, %cst_16 {dimension_numbers = #tpu.dot_dimension_numbers<[1], [0], [0], [1], [0, 0, 1, 1], [], []>} : vector<8x256xbf16>, vector<256x256xbf16>, vector<8x256xf32> -> vector<8x256xf32>
    %c1 = arith.constant 1 : index
    %c0_17 = arith.constant 0 : index
    %33 = vector.load %arg6[%c1, %c0_17] : memref<3x256xf32, #tpu.memory_space<vmem>>, vector<1x256xf32>
    %c1_18 = arith.constant 1 : index
    %c0_19 = arith.constant 0 : index
    %34 = vector.load %arg7[%c1_18, %c0_19] : memref<3x256xf32, #tpu.memory_space<vmem>>, vector<1x256xf32>
    %cst_20 = arith.constant dense<0.000000e+00> : vector<256xf32>
    %35 = vector.multi_reduction <add>, %32, %cst_20 [0] : vector<8x256xf32> to vector<256xf32>
    %36 = vector.shape_cast %35 : vector<256xf32> to vector<1x256xf32>
    %37 = arith.mulf %32, %32 : vector<8x256xf32>
    %cst_21 = arith.constant dense<0.000000e+00> : vector<256xf32>
    %38 = vector.multi_reduction <add>, %37, %cst_21 [0] : vector<8x256xf32> to vector<256xf32>
    %39 = vector.shape_cast %38 : vector<256xf32> to vector<1x256xf32>
    %cst_22 = arith.constant 1.250000e-01 : f32
    %40 = vector.broadcast %cst_22 : f32 to vector<1x256xf32>
    %41 = arith.mulf %36, %40 : vector<1x256xf32>
    %cst_23 = arith.constant 1.250000e-01 : f32
    %42 = vector.broadcast %cst_23 : f32 to vector<1x256xf32>
    %43 = arith.mulf %39, %42 : vector<1x256xf32>
    %44 = arith.mulf %41, %41 : vector<1x256xf32>
    %45 = arith.subf %43, %44 : vector<1x256xf32>
    %cst_24 = arith.constant 0.000000e+00 : f32
    %46 = vector.broadcast %cst_24 : f32 to vector<1x256xf32>
    %47 = arith.maximumf %45, %46 : vector<1x256xf32>
    %cst_25 = arith.constant 9.99999974E-6 : f32
    %48 = vector.broadcast %cst_25 : f32 to vector<1x256xf32>
    %49 = arith.addf %47, %48 : vector<1x256xf32>
    %50 = math.rsqrt %49 : vector<1x256xf32>
    %51 = arith.mulf %33, %50 : vector<1x256xf32>
    %52 = vector.broadcast %41 : vector<1x256xf32> to vector<8x256xf32>
    %53 = arith.subf %32, %52 : vector<8x256xf32>
    %54 = vector.broadcast %51 : vector<1x256xf32> to vector<8x256xf32>
    %55 = arith.mulf %53, %54 : vector<8x256xf32>
    %56 = vector.broadcast %34 : vector<1x256xf32> to vector<8x256xf32>
    %57 = arith.addf %55, %56 : vector<8x256xf32>
    %cst_26 = arith.constant 0.000000e+00 : f32
    %58 = vector.broadcast %cst_26 : f32 to vector<8x256xf32>
    %59 = arith.maximumf %57, %58 : vector<8x256xf32>
    %60 = arith.truncf %59 : vector<8x256xf32> to vector<8x256xbf16>
    %c0_27 = arith.constant 0 : index
    %c0_28 = arith.constant 0 : index
    %61 = vector.load %arg3[%c0_27, %c0_28] : memref<256x256xbf16, #tpu.memory_space<vmem>>, vector<256x256xbf16>
    %cst_29 = arith.constant dense<0.000000e+00> : vector<8x256xf32>
    %62 = tpu.matmul %60, %61, %cst_29 {dimension_numbers = #tpu.dot_dimension_numbers<[1], [0], [0], [1], [0, 0, 1, 1], [], []>} : vector<8x256xbf16>, vector<256x256xbf16>, vector<8x256xf32> -> vector<8x256xf32>
    %c2 = arith.constant 2 : index
    %c0_30 = arith.constant 0 : index
    %63 = vector.load %arg6[%c2, %c0_30] : memref<3x256xf32, #tpu.memory_space<vmem>>, vector<1x256xf32>
    %c2_31 = arith.constant 2 : index
    %c0_32 = arith.constant 0 : index
    %64 = vector.load %arg7[%c2_31, %c0_32] : memref<3x256xf32, #tpu.memory_space<vmem>>, vector<1x256xf32>
    %cst_33 = arith.constant dense<0.000000e+00> : vector<256xf32>
    %65 = vector.multi_reduction <add>, %62, %cst_33 [0] : vector<8x256xf32> to vector<256xf32>
    %66 = vector.shape_cast %65 : vector<256xf32> to vector<1x256xf32>
    %67 = arith.mulf %62, %62 : vector<8x256xf32>
    %cst_34 = arith.constant dense<0.000000e+00> : vector<256xf32>
    %68 = vector.multi_reduction <add>, %67, %cst_34 [0] : vector<8x256xf32> to vector<256xf32>
    %69 = vector.shape_cast %68 : vector<256xf32> to vector<1x256xf32>
    %cst_35 = arith.constant 1.250000e-01 : f32
    %70 = vector.broadcast %cst_35 : f32 to vector<1x256xf32>
    %71 = arith.mulf %66, %70 : vector<1x256xf32>
    %cst_36 = arith.constant 1.250000e-01 : f32
    %72 = vector.broadcast %cst_36 : f32 to vector<1x256xf32>
    %73 = arith.mulf %69, %72 : vector<1x256xf32>
    %74 = arith.mulf %71, %71 : vector<1x256xf32>
    %75 = arith.subf %73, %74 : vector<1x256xf32>
    %cst_37 = arith.constant 0.000000e+00 : f32
    %76 = vector.broadcast %cst_37 : f32 to vector<1x256xf32>
    %77 = arith.maximumf %75, %76 : vector<1x256xf32>
    %cst_38 = arith.constant 9.99999974E-6 : f32
    %78 = vector.broadcast %cst_38 : f32 to vector<1x256xf32>
    %79 = arith.addf %77, %78 : vector<1x256xf32>
    %80 = math.rsqrt %79 : vector<1x256xf32>
    %81 = arith.mulf %63, %80 : vector<1x256xf32>
    %82 = vector.broadcast %71 : vector<1x256xf32> to vector<8x256xf32>
    %83 = arith.subf %62, %82 : vector<8x256xf32>
    %84 = vector.broadcast %81 : vector<1x256xf32> to vector<8x256xf32>
    %85 = arith.mulf %83, %84 : vector<8x256xf32>
    %86 = vector.broadcast %64 : vector<1x256xf32> to vector<8x256xf32>
    %87 = arith.addf %85, %86 : vector<8x256xf32>
    %cst_39 = arith.constant 0.000000e+00 : f32
    %88 = vector.broadcast %cst_39 : f32 to vector<8x256xf32>
    %89 = arith.maximumf %87, %88 : vector<8x256xf32>
    %90 = arith.truncf %89 : vector<8x256xf32> to vector<8x256xbf16>
    %c0_40 = arith.constant 0 : index
    %c0_41 = arith.constant 0 : index
    %91 = vector.load %arg4[%c0_40, %c0_41] : memref<256x64xbf16, #tpu.memory_space<vmem>>, vector<256x64xbf16>
    %cst_42 = arith.constant dense<0.000000e+00> : vector<8x64xf32>
    %92 = tpu.matmul %90, %91, %cst_42 {dimension_numbers = #tpu.dot_dimension_numbers<[1], [0], [0], [1], [0, 0, 1, 1], [], []>} : vector<8x256xbf16>, vector<256x64xbf16>, vector<8x64xf32> -> vector<8x64xf32>
    %c0_43 = arith.constant 0 : index
    %c0_44 = arith.constant 0 : index
    %93 = vector.load %arg5[%c0_43, %c0_44] : memref<1x64xf32, #tpu.memory_space<vmem>>, vector<1x64xf32>
    %94 = vector.broadcast %93 : vector<1x64xf32> to vector<8x64xf32>
    %95 = arith.addf %92, %94 : vector<8x64xf32>
    %cst_45 = arith.constant 0.000000e+00 : f32
    %96 = vector.broadcast %cst_45 : f32 to vector<8x64xf32>
    %97 = arith.maximumf %95, %96 : vector<8x64xf32>
    %c0_46 = arith.constant 0 : index
    %c0_47 = arith.constant 0 : index
    %98 = vector.load %arg8[%c0_46, %c0_47] : memref<8x64xf32, #tpu.memory_space<vmem>>, vector<8x64xf32>
    tpu.vector_store %arg8[%c0_46, %c0_47], %97 {strides = array<i32>} : memref<8x64xf32, #tpu.memory_space<vmem>>, vector<8x64xf32>,
    return
  }
}

</mosaic_0001>

<bundles_post_ra>
// kernel: feature_generator.1
= control target key start
LH: loop header
LB: loop body
LE: loop exit
PB: predicated region body
PF: predicated region fallthrough
CT: control target
= control target key end

     0   :  { %13 = vsyncpa [#allocation3], 0  ;;  %s1570_s0 = inlined_call_operand.vmem [shape: bf16[8,32], index: 0, kind: input, shape index: {}]   ;;  %s1571_s1 = inlined_call_operand.vmem [shape: bf16[32,256], index: 1, kind: input, shape index: {}]   ;;  %s1572_s2 = inlined_call_operand.hbm [shape: bf16[256,256], index: 2, kind: input, shape index: {}]   ;;  %s1573_s3 = inlined_call_operand.hbm [shape: bf16[256,256], index: 3, kind: input, shape index: {}]   ;;  %s1574_s4 = inlined_call_operand.vmem [shape: bf16[256,64], index: 4, kind: input, shape index: {}]   ;;  %s1575_s5 = inlined_call_operand.vmem [shape: f32[1,64], index: 5, kind: input, shape index: {}]   ;;  %s1576_s6 = inlined_call_operand.vmem [shape: f32[3,256], index: 6, kind: input, shape index: {}]   ;;  %s1577_s7 = inlined_call_operand.vmem [shape: f32[3,256], index: 7, kind: input, shape index: {}]   ;;  %s1578_s8 = inlined_call_operand.hbm [shape: f32[8,64], index: 8, kind: output, shape index: {}]  }
   0x1   :  { %14 = vsyncpa [#allocation6], 0 }
   0x2   :  { %15 = vsyncpa [#allocation4], 0  ;;  %s1387_s27 = smov [#allocation2]  }
   0x3   :  { %s25_s28 = sshll.u32 %s1387_s27, 4  ;;  %s26_s28 = int_to_ptr.vmem [resolvable:$true] %s25_s28 }
   0x4   :  { %s1329_s29 = scalar_lea.vmem %s26_s28, 4096  ;;  %p1334_p1 = scmp.lt.s32.totalorder %s26_s28, %s26_s28 }
   0x5   :  { %p1330_p0 = scmp.ne.s32.totalorder %s26_s28, %s1329_s29  ;;  %p1335_p2 = scmp.lt.s32.totalorder %s1329_s29, %s1329_s29 }
   0x7   :  { %p1336_p3 = por %p1335_p2, %p1334_p1 }
   0x9   :  { %p1337_p4 = pnand %p1336_p3, %p1330_p0 }
   0xb   :  { %1340 = shalt.err (!%p1337_p4)
}
   0xc   :  { %s1388_s30 = smov 128   ;;  %s1389_s9 = smov 8  }
   0xd   :  { %31 = dma.hbm_to_vmem [thread:$0]  %s1572_s2, 4096, %s26_s28, [#allocation3], %s1388_s30, %s1388_s30, %s1389_s9  }
   0xe   :  { %s1390_s12 = smov [#allocation5]  }
   0xf   :  { %s37_s13 = sshll.u32 %s1390_s12, 4  ;;  %s38_s13 = int_to_ptr.vmem [resolvable:$true] %s37_s13 }
  0x10   :  { %s1349_s14 = scalar_lea.vmem %s38_s13, 4096  ;;  %p1354_p6 = scmp.lt.s32.totalorder %s38_s13, %s38_s13 }
  0x11   :  { %p1350_p5 = scmp.ne.s32.totalorder %s38_s13, %s1349_s14  ;;  %p1355_p7 = scmp.lt.s32.totalorder %s1349_s14, %s1349_s14 }
  0x13   :  { %p1356_p8 = por %p1355_p7, %p1354_p6 }
  0x15   :  { %p1357_p9 = pnand %p1356_p8, %p1350_p5 }
  0x17   :  { %1360 = shalt.err (!%p1357_p9)
}
  0x18   :  { %43 = dma.hbm_to_vmem [thread:$0]  %s1573_s3, 4096, %s38_s13, [#allocation6], %s1388_s30, %s1388_s30, %s1389_s9  }
  0x19   :  { %1381 = dma.done.wait [#allocation3], 4096  }
  0x1a   :  { %1382 = vsyncadd [#allocation3], 4294963200 }
  0x1b   :  { %1383 = dma.done.wait [#allocation6], 4096  }
  0x1c   :  { %1384 = vsyncadd [#allocation6], 4294963200  ;;  %v1391_v0 = vmov 0   ;;  %v1191_v1 = vld [vmem:[%s1571_s1 + $0x14] ss:$8 sps:$4 sm:$0xff]   ;;  %vm84_vm0 = vcmask 261120  }
  0x1d   :  { %120 = vmatprep.mubr.bf16.mxu0 %v1391_v0  ;;  %v1193_v2 = vld [vmem:[%s1571_s1 + $0x10] ss:$8 sps:$4 sm:$0xff]   ;;  %100 = vmatprep.subr.bf16.mxu0 %v1191_v1  ;;  %v1194_v3 = vld [vmem:[%s1571_s1 + $0x4] ss:$8 sps:$4 sm:$0xff]   ;;  %v1196_v4 = vld [vmem:[%s1571_s1] ss:$8 sps:$4 sm:$0xff]  }
  0x1e   :  { %101 = vmatpush1.bf16.msra.mxu0 %v1193_v2  ;;  %v1197_v5 = vld [vmem:[#allocation2 + $0x74] ss:$8 sps:$4 sm:$0xff]   ;;  %v1199_v6 = vld [vmem:[#allocation2 + $0x70] ss:$8 sps:$4 sm:$0xff]   ;;  %v59_v7 = vld [vmem:[%s1570_s0] sm:$0xf] }
  0x1f   :  { %102 = vmatprep.subr.bf16.mxu0 %v1194_v3  ;;  %414 = vmatprep.subr.bf16.mxu1 %v1197_v5  ;;  %v1200_v8 = vld [vmem:[#allocation2 + $0x64] ss:$8 sps:$4 sm:$0xff]   ;;  %v1202_v9 = vld [vmem:[#allocation2 + $0x60] ss:$8 sps:$4 sm:$0xff]   ;;  %v1203_v10 = vld [vmem:[#allocation2 + $0x54] ss:$8 sps:$4 sm:$0xff]  }
  0x20   :  { %415 = vmatpush1.bf16.msra.mxu1 %v1199_v6  ;;  %v1205_v11 = vld [vmem:[#allocation2 + $0x50] ss:$8 sps:$4 sm:$0xff]   ;;  %v1206_v12 = vld [vmem:[#allocation2 + $0x44] ss:$8 sps:$4 sm:$0xff]   ;;  %v1208_v13 = vld [vmem:[#allocation2 + $0x40] ss:$8 sps:$4 sm:$0xff]  }
  0x21   :  { %416 = vmatprep.subr.bf16.mxu1 %v1200_v8  ;;  %v1209_v14 = vld [vmem:[#allocation2 + $0x34] ss:$8 sps:$4 sm:$0xff]   ;;  %v1211_v15 = vld [vmem:[#allocation2 + $0x30] ss:$8 sps:$4 sm:$0xff]   ;;  %v1212_v16 = vld [vmem:[#allocation2 + $0x24] ss:$8 sps:$4 sm:$0xff]  }
  0x22   :  { %103 = vmatpush1.bf16.msra.mxu0 %v1196_v4  ;;  %v1214_v17 = vld [vmem:[#allocation2 + $0x20] ss:$8 sps:$4 sm:$0xff]   ;;  %v1215_v18 = vld [vmem:[#allocation2 + $0x14] ss:$8 sps:$4 sm:$0xff]   ;;  %v1217_v19 = vld [vmem:[#allocation2 + $0x10] ss:$8 sps:$4 sm:$0xff]  }
  0x23   :  { %v1218_v20 = vld [vmem:[#allocation2 + $0x4] ss:$8 sps:$4 sm:$0xff]   ;;  %v1220_v21 = vld [vmem:[#allocation2] ss:$8 sps:$4 sm:$0xff]   ;;  %v1221_v22 = vld [vmem:[#allocation2 + $0xf4] ss:$8 sps:$4 sm:$0xff]  }
  0x24   :  { %417 = vmatpush1.bf16.msra.mxu1 %v1202_v9  ;;  %v1223_v23 = vld [vmem:[#allocation2 + $0xf0] ss:$8 sps:$4 sm:$0xff]   ;;  %v1224_v24 = vld [vmem:[#allocation2 + $0xe4] ss:$8 sps:$4 sm:$0xff]   ;;  %v1226_v25 = vld [vmem:[#allocation2 + $0xe0] ss:$8 sps:$4 sm:$0xff]  }
  0x25   :  { %1076 = vmatmul.mubr.msk.bf16.vlgmr.msra.gmra.mxu0 %vm84_vm0, %v59_v7  ;;  %418 = vmatprep.subr.bf16.mxu1 %v1203_v10  ;;  %v1227_v26 = vld [vmem:[#allocation2 + $0xd4] ss:$8 sps:$4 sm:$0xff]   ;;  %v1229_v27 = vld [vmem:[#allocation2 + $0xd0] ss:$8 sps:$4 sm:$0xff]   ;;  %v1230_v28 = vld [vmem:[#allocation2 + $0xc4] ss:$8 sps:$4 sm:$0xff]  }
  0x26   :  { %v1232_v29 = vld [vmem:[#allocation2 + $0xc0] ss:$8 sps:$4 sm:$0xff]   ;;  %v1233_v30 = vld [vmem:[#allocation2 + $0xb4] ss:$8 sps:$4 sm:$0xff]   ;;  %v1235_v31 = vld [vmem:[#allocation2 + $0xb0] ss:$8 sps:$4 sm:$0xff]  }
  0x27   :  { %v1236_v32 = vld [vmem:[#allocation2 + $0xa4] ss:$8 sps:$4 sm:$0xff]   ;;  %v1238_v33 = vld [vmem:[#allocation2 + $0xa0] ss:$8 sps:$4 sm:$0xff]   ;;  %v1239_v34 = vld [vmem:[#allocation2 + $0x94] ss:$8 sps:$4 sm:$0xff]  }
  0x28   :  { %419 = vmatpush1.bf16.msra.mxu1 %v1205_v11  ;;  %v1241_v35 = vld [vmem:[#allocation2 + $0x90] ss:$8 sps:$4 sm:$0xff]   ;;  %v1242_v36 = vld [vmem:[#allocation2 + $0x84] ss:$8 sps:$4 sm:$0xff]   ;;  %v1244_v37 = vld [vmem:[#allocation2 + $0x80] ss:$8 sps:$4 sm:$0xff]  }
  0x29   :  { %420 = vmatprep.subr.bf16.mxu1 %v1206_v12  ;;  %v1245_v38 = vld [vmem:[#allocation5 + $0x70] ss:$8 sps:$4 sm:$0xff]   ;;  %v1247_v39 = vld [vmem:[#allocation5 + $0x74] ss:$8 sps:$4 sm:$0xff]   ;;  %v1250_v40 = vld [vmem:[#allocation5 + $0x64] ss:$8 sps:$4 sm:$0xff]  }
  0x2a   :  { %742 = vmatprep.subr.bf16.mxu0 %v1247_v39  ;;  %v1248_v41 = vld [vmem:[#allocation5 + $0x60] ss:$8 sps:$4 sm:$0xff]   ;;  %s1393_s17 = smov [#allocation7]   ;;  %vm1054_vm1 = vcmask 523264  }
  0x2b   :  { %743 = vmatpush1.bf16.msra.mxu0 %v1245_v38  ;;  %s1062_s18 = sshll.u32 %s1393_s17, 4  ;;  %s1063_s18 = int_to_ptr.vmem [resolvable:$true] %s1062_s18 }
  0x2c   :  { %421 = vmatpush1.bf16.msra.mxu1 %v1208_v13  ;;  %744 = vmatprep.subr.bf16.mxu0 %v1250_v40  ;;  %s1361_s19 = scalar_lea.vmem %s1063_s18, 128  ;;  %p1366_p11 = scmp.lt.s32.totalorder %s1063_s18, %s1063_s18 }
  0x2d   :  { %422 = vmatprep.subr.bf16.mxu1 %v1209_v14  ;;  %p1362_p10 = scmp.ne.s32.totalorder %s1063_s18, %s1361_s19  ;;  %p1367_p12 = scmp.lt.s32.totalorder %s1361_s19, %s1361_s19 }
  0x2f   :  { %745 = vmatpush1.bf16.msra.mxu0 %v1248_v41  ;;  %p1368_p13 = por %p1367_p12, %p1366_p11 }
  0x30   :  { %423 = vmatpush1.bf16.msra.mxu1 %v1211_v15 }
  0x31   :  { %424 = vmatprep.subr.bf16.mxu1 %v1212_v16  ;;  %p1369_p0 = pnand %p1368_p13, %p1362_p10 }
  0x34   :  { %425 = vmatpush1.bf16.msra.mxu1 %v1214_v17 }
  0x35   :  { %426 = vmatprep.subr.bf16.mxu1 %v1215_v18 }
  0x38   :  { %427 = vmatpush1.bf16.msra.mxu1 %v1217_v19 }
  0x39   :  { %428 = vmatprep.subr.bf16.mxu1 %v1218_v20  ;;  %v1392_v20 = vmov 1966171168  }
  0x3c   :  { %429 = vmatpush1.bf16.msra.mxu1 %v1220_v21  ;;  %v175_v21 = vunpack.c.l.s4 %v1392_v20 }
  0x3d   :  { %430 = vmatprep.subr.bf16.mxu1 %v1221_v22  ;;  %v177_v22 = vlaneseq }
  0x40   :  { %431 = vmatpush2.bf16.msra.mxu1 %v1223_v23  ;;  %v176_v23 = vunpack.c.0.s8 %v175_v21 }
  0x41   :  { %432 = vmatprep.subr.bf16.mxu1 %v1224_v24  ;;  %v178_v24 = vshrl.u32 %v177_v22, 7 }
  0x44   :  { %433 = vmatpush2.bf16.msra.mxu1 %v1226_v25 }
  0x45   :  { %434 = vmatprep.subr.bf16.mxu1 %v1227_v26  ;;  %v1472_v26 = vsub.s32 %v176_v23, %v178_v24 }
  0x48   :  { %435 = vmatpush2.bf16.msra.mxu1 %v1229_v27 }
  0x49   :  { %436 = vmatprep.subr.bf16.mxu1 %v1230_v28 }
  0x4c   :  { %437 = vmatpush2.bf16.msra.mxu1 %v1232_v29 }
  0x4d   :  { %438 = vmatprep.subr.bf16.mxu1 %v1233_v30  ;;  %v129_v30 = vld [vmem:[%s1576_s6] ss:$4 sm:$0x3] }
  0x50   :  { %439 = vmatpush2.bf16.msra.mxu1 %v1235_v31  ;;  %v130_v31 = vld [vmem:[%s1577_s7] ss:$4 sm:$0x3] }
  0x51   :  { %440 = vmatprep.subr.bf16.mxu1 %v1236_v32 }
  0x54   :  { %441 = vmatpush2.bf16.msra.mxu1 %v1238_v33  ;;  %v1482_v33 = vsub.s32 0, %v178_v24 }
  0x55   :  { %442 = vmatprep.subr.bf16.mxu1 %v1239_v34  ;;  %v1484_v34 = vsub.s32 1, %v178_v24 }
  0x58   :  { %443 = vmatpush2.bf16.msra.mxu1 %v1241_v35 }
  0x59   :  { %444 = vmatprep.subr.bf16.mxu1 %v1242_v36  ;;  %v209_v36 = vrot.slane %v130_v31, %v1482_v33 }
  0x5c   :  { %445 = vmatpush2.bf16.msra.mxu1 %v1244_v37  ;;  %v213_v37 = vrot.slane %v130_v31, %v1484_v34 }
  0xe5   :  { %v1460_v42 = vpop.f32.mrf.mxu0 }
  0xe6   :  { %v131_v43 = vrot.slane %v1460_v42, 4  ;;  %v143_v44 = vmul.f32 %v1460_v42, %v1460_v42 }
  0xe7   :  { %v1465_v45 = vpop.f32.mrf.mxu0 }
  0xe8   :  { %v132_v46 = vadd.f32 %v131_v43, %v1460_v42  ;;  %v145_v47 = vrot.slane %v143_v44, 4  ;;  %v137_v48 = vrot.slane %v1465_v45, 4  ;;  %v144_v49 = vmul.f32 %v1465_v45, %v1465_v45 }
  0xe9   :  { %v126_v50 = vpop.f32.mrf.mxu0 }
  0xea   :  { %v133_v51 = vrot.slane %v132_v46, 2  ;;  %v146_v52 = vadd.f32 %v145_v47, %v143_v44  ;;  %v138_v53 = vadd.f32 %v137_v48, %v1465_v45  ;;  %v151_v54 = vrot.slane %v144_v49, 4 }
  0xeb   :  { %v127_v55 = vpop.f32.mrf.mxu0 }
  0xec   :  { %v134_v56 = vadd.f32 %v133_v51, %v132_v46  ;;  %v147_v57 = vrot.slane %v146_v52, 2  ;;  %v139_v58 = vrot.slane %v138_v53, 2  ;;  %v152_v59 = vadd.f32 %v151_v54, %v144_v49  ;;  %v1259_v54 = vld [vmem:[#allocation5 + $0x34] ss:$8 sps:$4 sm:$0xff]   ;;  %v1257_v55 = vld [vmem:[#allocation5 + $0x30] ss:$8 sps:$4 sm:$0xff]  }
  0xee   :  { %v135_v60 = vrot.slane %v134_v56, 1  ;;  %v148_v61 = vadd.f32 %v147_v57, %v146_v52  ;;  %v140_v62 = vadd.f32 %v139_v58, %v138_v53  ;;  %v153_v63 = vrot.slane %v152_v59, 2  ;;  %v1253_v52 = vld [vmem:[#allocation5 + $0x54] ss:$8 sps:$4 sm:$0xff]   ;;  %v1251_v53 = vld [vmem:[#allocation5 + $0x50] ss:$8 sps:$4 sm:$0xff]  }
  0xef   :  { %746 = vmatprep.subr.bf16.mxu0 %v1253_v52  ;;  %v1260_v57 = vld [vmem:[#allocation5 + $0x20] ss:$8 sps:$4 sm:$0xff]   ;;  %v1265_v58 = vld [vmem:[#allocation5 + $0x14] ss:$8 sps:$4 sm:$0xff]  }
  0xf0   :  { %v136_v0 = vadd.f32 %v135_v60, %v134_v56  ;;  %v149_v1 = vrot.slane %v148_v61, 1  ;;  %v154_v2 = vadd.f32 %v153_v63, %v152_v59  ;;  %v141_v3 = vrot.slane %v140_v62, 1  ;;  %747 = vmatpush1.bf16.msra.mxu0 %v1251_v53  ;;  %v1262_v56 = vld [vmem:[#allocation5 + $0x24] ss:$8 sps:$4 sm:$0xff]   ;;  %v1263_v59 = vld [vmem:[#allocation5 + $0x10] ss:$8 sps:$4 sm:$0xff]  }
  0xf1   :  { %v1268_v60 = vld [vmem:[#allocation5 + $0x4] ss:$8 sps:$4 sm:$0xff]   ;;  %v1269_v63 = vld [vmem:[#allocation5 + $0xf0] ss:$8 sps:$4 sm:$0xff]  }
  0xf2   :  { %v150_v4 = vadd.f32 %v149_v1, %v148_v61  ;;  %v157_v5 = vmul.f32 0.125, %v136_v0  ;;  %v155_v6 = vrot.slane %v154_v2, 1  ;;  %v142_v7 = vadd.f32 %v141_v3, %v140_v62  ;;  %v1266_v61 = vld [vmem:[#allocation5] ss:$8 sps:$4 sm:$0xff]   ;;  %v1271_v62 = vld [vmem:[#allocation5 + $0xf4] ss:$8 sps:$4 sm:$0xff]  }
  0xf3   :  { %v1274_v0 = vld [vmem:[#allocation5 + $0xe4] ss:$8 sps:$4 sm:$0xff]   ;;  %v1272_v1 = vld [vmem:[#allocation5 + $0xe0] ss:$8 sps:$4 sm:$0xff]   ;;  %v1275_v3 = vld [vmem:[#allocation5 + $0xd0] ss:$8 sps:$4 sm:$0xff]  }
  0xf4   :  { %v159_v8 = vmul.f32 0.125, %v150_v4  ;;  %v161_v9 = vmul.f32 %v157_v5, %v157_v5  ;;  %v156_v10 = vadd.f32 %v155_v6, %v154_v2  ;;  %v158_v11 = vmul.f32 0.125, %v142_v7  ;;  %v1277_v2 = vld [vmem:[#allocation5 + $0xd4] ss:$8 sps:$4 sm:$0xff]   ;;  %v1280_v4 = vld [vmem:[#allocation5 + $0xc4] ss:$8 sps:$4 sm:$0xff]  }
  0xf5   :  { %v190_v38 = vsub.f32 %v1460_v42, %v157_v5  ;;  %v1256_v42 = vld [vmem:[#allocation5 + $0x44] ss:$8 sps:$4 sm:$0xff]   ;;  %v1278_v5 = vld [vmem:[#allocation5 + $0xc0] ss:$8 sps:$4 sm:$0xff]   ;;  %v1283_v6 = vld [vmem:[#allocation5 + $0xb4] ss:$8 sps:$4 sm:$0xff]  }
  0xf6   :  { %v163_v12 = vsub.f32 %v159_v8, %v161_v9  ;;  %v160_v13 = vmul.f32 0.125, %v156_v10  ;;  %v162_v14 = vmul.f32 %v158_v11, %v158_v11  ;;  %v191_v39 = vsub.f32 %v1465_v45, %v158_v11  ;;  %v1254_v45 = vld [vmem:[#allocation5 + $0x40] ss:$8 sps:$4 sm:$0xff]   ;;  %748 = vmatprep.subr.bf16.mxu0 %v1256_v42  ;;  %v1281_v7 = vld [vmem:[#allocation5 + $0xb0] ss:$8 sps:$4 sm:$0xff]  }
  0xf7   :  { %749 = vmatpush1.bf16.msra.mxu0 %v1254_v45  ;;  %v1286_v8 = vld [vmem:[#allocation5 + $0xa4] ss:$8 sps:$4 sm:$0xff]   ;;  %v1284_v9 = vld [vmem:[#allocation5 + $0xa0] ss:$8 sps:$4 sm:$0xff]   ;;  %v1289_v10 = vld [vmem:[#allocation5 + $0x94] ss:$8 sps:$4 sm:$0xff]  }
  0xf8   :  { %v165_v15 = vmax.f32 %v163_v12, 0.0  ;;  %v164_v16 = vsub.f32 %v160_v13, %v162_v14  ;;  %750 = vmatprep.subr.bf16.mxu0 %v1259_v54  ;;  %v1287_v11 = vld [vmem:[#allocation5 + $0x90] ss:$8 sps:$4 sm:$0xff]   ;;  %v1292_v12 = vld [vmem:[#allocation5 + $0x84] ss:$8 sps:$4 sm:$0xff]  }
  0xf9   :  { %v1290_v13 = vld [vmem:[#allocation5 + $0x80] ss:$8 sps:$4 sm:$0xff]  }
  0xfa   :  { %v167_v17 = vadd.f32 1e-05, %v165_v15  ;;  %v166_v18 = vmax.f32 %v164_v16, 0.0 }
  0xfb   :  { %751 = vmatpush1.bf16.msra.mxu0 %v1257_v55 }
  0xfc   :  { %v168_v19 = vadd.f32 1e-05, %v166_v18  ;;  %1309 = vrsqrt.f32 %v167_v17  ;;  %752 = vmatprep.subr.bf16.mxu0 %v1262_v56 }
  0xfe   :  { %1311 = vrsqrt.f32 %v168_v19 }
  0xff   :  { %753 = vmatpush1.bf16.msra.mxu0 %v1260_v57 }
 0x100   :  { %754 = vmatprep.subr.bf16.mxu0 %v1265_v58 }
 0x103   :  { %755 = vmatpush1.bf16.msra.mxu0 %v1263_v59 }
 0x104   :  { %756 = vmatprep.subr.bf16.mxu0 %v1268_v60 }
 0x107   :  { %757 = vmatpush1.bf16.msra.mxu0 %v1266_v61 }
 0x108   :  { %758 = vmatprep.subr.bf16.mxu0 %v1271_v62 }
 0x109   :  { %v1310_v25 = vpop.eup %1309 }
 0x10b   :  { %v1312_v27 = vpop.eup %1311  ;;  %759 = vmatpush2.bf16.msra.mxu0 %v1269_v63  ;;  %v1109_v63 = vld [vmem:[%s1576_s6 + $0x1] ss:$4 sm:$0x3] }
 0x10c   :  { %v173_v28 = vcombine.low %v1310_v25, %v1312_v27  ;;  %760 = vmatprep.subr.bf16.mxu0 %v1274_v0  ;;  %v1110_v0 = vld [vmem:[%s1577_s7 + $0x1] ss:$4 sm:$0x3] }
 0x10e   :  { %v180_v29 = vrot.slane %v173_v28, %v1472_v26 }
 0x10f   :  { %761 = vmatpush2.bf16.msra.mxu0 %v1272_v1 }
 0x110   :  { %v187_v32 = vrot.slane %v180_v29, %v1472_v26  ;;  %762 = vmatprep.subr.bf16.mxu0 %v1277_v2 }
 0x112   :  { %v189_v35 = vmul.f32 %v187_v32, %v129_v30 }
 0x113   :  { %763 = vmatpush2.bf16.msra.mxu0 %v1275_v3  ;;  %v537_v3 = vrot.slane %v1110_v0, %v1482_v33 }
 0x114   :  { %v200_v40 = vrot.slane %v189_v35, %v1484_v34  ;;  %v196_v41 = vrot.slane %v189_v35, %v1482_v33  ;;  %764 = vmatprep.subr.bf16.mxu0 %v1280_v4  ;;  %v541_v4 = vrot.slane %v1110_v0, %v1484_v34 }
 0x116   :  { %v204_v43 = vmul.f32 %v200_v40, %v191_v39  ;;  %v203_v44 = vmul.f32 %v196_v41, %v190_v38 }
 0x117   :  { %765 = vmatpush2.bf16.msra.mxu0 %v1278_v5 }
 0x118   :  { %v217_v46 = vadd.f32 %v213_v37, %v204_v43  ;;  %v216_v47 = vadd.f32 %v209_v36, %v203_v44  ;;  %766 = vmatprep.subr.bf16.mxu0 %v1283_v6 }
 0x11a   :  { %v219_v48 = vmax.f32 %v217_v46, 0.0  ;;  %v218_v49 = vmax.f32 %v216_v47, 0.0 }
 0x11b   :  { %767 = vmatpush2.bf16.msra.mxu0 %v1281_v7 }
 0x11c   :  { %v221_v50 = vpack.c.bf16 %v219_v48, %v219_v48  ;;  %v220_v51 = vpack.c.bf16 %v218_v49, %v218_v49  ;;  %768 = vmatprep.subr.bf16.mxu0 %v1286_v8 }
 0x11e   :  { %446 = vmatprep.mubr.bf16.mxu1 %v221_v50 }
 0x11f   :  { %447 = vmatmul.mubr.bf16.vlgmr.msra.gmra.mxu1 %v220_v51  ;;  %769 = vmatpush2.bf16.msra.mxu0 %v1284_v9 }
 0x120   :  { %770 = vmatprep.subr.bf16.mxu0 %v1289_v10 }
 0x123   :  { %771 = vmatpush2.bf16.msra.mxu0 %v1287_v11 }
 0x124   :  { %772 = vmatprep.subr.bf16.mxu0 %v1292_v12 }
 0x127   :  { %773 = vmatpush2.bf16.msra.mxu0 %v1290_v13 }
 0x1df   :  { %v448_v14 = vpop.f32.mrf.mxu1 }
 0x1e0   :  { %v459_v15 = vrot.slane %v448_v14, 4  ;;  %v471_v16 = vmul.f32 %v448_v14, %v448_v14 }
 0x1e1   :  { %v450_v17 = vpop.f32.mrf.mxu1 }
 0x1e2   :  { %v460_v18 = vadd.f32 %v459_v15, %v448_v14  ;;  %v473_v19 = vrot.slane %v471_v16, 4  ;;  %v465_v20 = vrot.slane %v450_v17, 4  ;;  %v472_v21 = vmul.f32 %v450_v17, %v450_v17 }
 0x1e3   :  { %v452_v22 = vpop.f32.mrf.mxu1 }
 0x1e4   :  { %v461_v23 = vrot.slane %v460_v18, 2  ;;  %v474_v24 = vadd.f32 %v473_v19, %v471_v16  ;;  %v466_v25 = vadd.f32 %v465_v20, %v450_v17  ;;  %v479_v27 = vrot.slane %v472_v21, 4  ;;  %v1293_v19 = vld [vmem:[%s1574_s4 + $0x78] sm:$0xff]   ;;  %v1296_v20 = vld [vmem:[%s1574_s4 + $0x30] sm:$0xff]   ;;  %v1298_v22 = vld [vmem:[%s1574_s4 + $0x28] sm:$0xff]  }
 0x1e5   :  { %v453_v28 = vpop.f32.mrf.mxu1  ;;  %1162 = vmatprep.subr.bf16.mxu1 %v1293_v19 }
 0x1e6   :  { %v462_v29 = vadd.f32 %v461_v23, %v460_v18  ;;  %v475_v30 = vrot.slane %v474_v24, 2  ;;  %v467_v31 = vrot.slane %v466_v25, 2  ;;  %v480_v32 = vadd.f32 %v479_v27, %v472_v21  ;;  %v1297_v21 = vld [vmem:[%s1574_s4 + $0x68] sm:$0xff]   ;;  %v1299_v23 = vld [vmem:[%s1574_s4 + $0x60] sm:$0xff]   ;;  %v1302_v27 = vld [vmem:[%s1574_s4 + $0x18] sm:$0xff]  }
 0x1e7   :  { %v1303_v28 = vld [vmem:[%s1574_s4 + $0x50] sm:$0xff]  }
 0x1e8   :  { %v463_v35 = vrot.slane %v462_v29, 1  ;;  %v476_v36 = vadd.f32 %v475_v30, %v474_v24  ;;  %v468_v37 = vadd.f32 %v467_v31, %v466_v25  ;;  %v481_v38 = vrot.slane %v480_v32, 2  ;;  %v1300_v24 = vld [vmem:[%s1574_s4 + $0x20] sm:$0xff]   ;;  %v1301_v25 = vld [vmem:[%s1574_s4 + $0x58] sm:$0xff]   ;;  %v1305_v30 = vld [vmem:[%s1574_s4 + $0x48] sm:$0xff]  }
 0x1e9   :  { %v1306_v31 = vld [vmem:[%s1574_s4 + $0x8] sm:$0xff]  }
 0x1ea   :  { %v464_v39 = vadd.f32 %v463_v35, %v462_v29  ;;  %v477_v40 = vrot.slane %v476_v36, 1  ;;  %v469_v41 = vrot.slane %v468_v37, 1  ;;  %v482_v43 = vadd.f32 %v481_v38, %v480_v32  ;;  %v1304_v29 = vld [vmem:[%s1574_s4 + $0x10] sm:$0xff]   ;;  %v1307_v32 = vld [vmem:[%s1574_s4 + $0x40] sm:$0xff]  }
 0x1eb   :  { %v1308_v35 = vld [vmem:[%s1574_s4] sm:$0xff]  }
 0x1ec   :  { %v478_v44 = vadd.f32 %v477_v40, %v476_v36  ;;  %v485_v46 = vmul.f32 0.125, %v464_v39  ;;  %v470_v47 = vadd.f32 %v469_v41, %v468_v37  ;;  %v483_v48 = vrot.slane %v482_v43, 1 }
 0x1ee   :  { %v487_v49 = vmul.f32 0.125, %v478_v44  ;;  %v489_v50 = vmul.f32 %v485_v46, %v485_v46  ;;  %v484_v51 = vadd.f32 %v483_v48, %v482_v43  ;;  %v486_v52 = vmul.f32 0.125, %v470_v47 }
 0x1ef   :  { %v518_v5 = vsub.f32 %v448_v14, %v485_v46  ;;  %v1294_v14 = vld [vmem:[%s1574_s4 + $0x38] sm:$0xff]  }
 0x1f0   :  { %v491_v53 = vsub.f32 %v487_v49, %v489_v50  ;;  %v488_v42 = vmul.f32 0.125, %v484_v51  ;;  %v490_v45 = vmul.f32 %v486_v52, %v486_v52  ;;  %v519_v6 = vsub.f32 %v450_v17, %v486_v52  ;;  %v1295_v17 = vld [vmem:[%s1574_s4 + $0x70] sm:$0xff]   ;;  %1163 = vmatpush3.bf16.msra.mxu1 %v1294_v14  ;;  %v1143_v14 = vld [vmem:[%s1576_s6 + $0x2] ss:$4 sm:$0x3] }
 0x1f1   :  { %1164 = vmatprep.subr.bf16.mxu1 %v1295_v17  ;;  %v1144_v17 = vld [vmem:[%s1577_s7 + $0x2] ss:$4 sm:$0x3] }
 0x1f2   :  { %v493_v54 = vmax.f32 %v491_v53, 0.0  ;;  %v492_v55 = vsub.f32 %v488_v42, %v490_v45 }
 0x1f4   :  { %v495_v56 = vadd.f32 1e-05, %v493_v54  ;;  %v494_v57 = vmax.f32 %v492_v55, 0.0  ;;  %1165 = vmatpush3.bf16.msra.mxu1 %v1296_v20 }
 0x1f5   :  { %1166 = vmatprep.subr.bf16.mxu1 %v1297_v21 }
 0x1f6   :  { %v496_v58 = vadd.f32 1e-05, %v494_v57  ;;  %1313 = vrsqrt.f32 %v495_v56 }
 0x1f8   :  { %1315 = vrsqrt.f32 %v496_v58  ;;  %1167 = vmatpush3.bf16.msra.mxu1 %v1298_v22  ;;  %v865_v22 = vrot.slane %v1144_v17, %v1482_v33 }
 0x1f9   :  { %1168 = vmatprep.subr.bf16.mxu1 %v1299_v23  ;;  %v869_v23 = vrot.slane %v1144_v17, %v1484_v34 }
 0x1fc   :  { %1169 = vmatpush3.bf16.msra.mxu1 %v1300_v24 }
 0x1fd   :  { %1170 = vmatprep.subr.bf16.mxu1 %v1301_v25 }
 0x200   :  { %1171 = vmatpush3.bf16.msra.mxu1 %v1302_v27 }
 0x201   :  { %1172 = vmatprep.subr.bf16.mxu1 %v1303_v28 }
 0x203   :  { %v1314_v59 = vpop.eup %1313 }
 0x204   :  { %1173 = vmatpush3.bf16.msra.mxu1 %v1304_v29 }
 0x205   :  { %v1316_v60 = vpop.eup %1315  ;;  %1174 = vmatprep.subr.bf16.mxu1 %v1305_v30 }
 0x206   :  { %v501_v61 = vcombine.low %v1314_v59, %v1316_v60 }
 0x208   :  { %v508_v62 = vrot.slane %v501_v61, %v1472_v26  ;;  %1175 = vmatpush3.bf16.msra.mxu1 %v1306_v31 }
 0x209   :  { %1176 = vmatprep.subr.bf16.mxu1 %v1307_v32 }
 0x20a   :  { %v515_v1 = vrot.slane %v508_v62, %v1472_v26 }
 0x20c   :  { %v517_v2 = vmul.f32 %v1109_v63, %v515_v1  ;;  %1177 = vmatpush3.bf16.msra.mxu1 %v1308_v35 }
 0x20e   :  { %v528_v7 = vrot.slane %v517_v2, %v1484_v34  ;;  %v524_v8 = vrot.slane %v517_v2, %v1482_v33 }
 0x210   :  { %v532_v9 = vmul.f32 %v528_v7, %v519_v6  ;;  %v531_v10 = vmul.f32 %v524_v8, %v518_v5 }
 0x212   :  { %v545_v11 = vadd.f32 %v541_v4, %v532_v9  ;;  %v544_v12 = vadd.f32 %v537_v3, %v531_v10 }
 0x214   :  { %v547_v13 = vmax.f32 %v545_v11, 0.0  ;;  %v546_v15 = vmax.f32 %v544_v12, 0.0 }
 0x216   :  { %v549_v16 = vpack.c.bf16 %v547_v13, %v547_v13  ;;  %v548_v18 = vpack.c.bf16 %v546_v15, %v546_v15 }
 0x218   :  { %774 = vmatprep.mubr.bf16.mxu0 %v549_v16 }
 0x219   :  { %775 = vmatmul.mubr.bf16.vlgmr.msra.gmra.mxu0 %v548_v18 }
 0x2d9   :  { %v776_v36 = vpop.f32.mrf.mxu0 }
 0x2da   :  { %v787_v37 = vrot.slane %v776_v36, 4  ;;  %v799_v38 = vmul.f32 %v776_v36, %v776_v36 }
 0x2db   :  { %v778_v39 = vpop.f32.mrf.mxu0 }
 0x2dc   :  { %v788_v40 = vadd.f32 %v787_v37, %v776_v36  ;;  %v801_v41 = vrot.slane %v799_v38, 4  ;;  %v793_v43 = vrot.slane %v778_v39, 4  ;;  %v800_v44 = vmul.f32 %v778_v39, %v778_v39 }
 0x2dd   :  { %v780_v46 = vpop.f32.mrf.mxu0 }
 0x2de   :  { %v789_v47 = vrot.slane %v788_v40, 2  ;;  %v802_v48 = vadd.f32 %v801_v41, %v799_v38  ;;  %v794_v49 = vadd.f32 %v793_v43, %v778_v39  ;;  %v807_v50 = vrot.slane %v800_v44, 4 }
 0x2df   :  { %v781_v51 = vpop.f32.mrf.mxu0 }
 0x2e0   :  { %v790_v52 = vadd.f32 %v789_v47, %v788_v40  ;;  %v803_v53 = vrot.slane %v802_v48, 2  ;;  %v795_v42 = vrot.slane %v794_v49, 2  ;;  %v808_v45 = vadd.f32 %v807_v50, %v800_v44 }
 0x2e2   :  { %v791_v54 = vrot.slane %v790_v52, 1  ;;  %v804_v55 = vadd.f32 %v803_v53, %v802_v48  ;;  %v796_v56 = vadd.f32 %v795_v42, %v794_v49  ;;  %v809_v57 = vrot.slane %v808_v45, 2 }
 0x2e4   :  { %v792_v58 = vadd.f32 %v791_v54, %v790_v52  ;;  %v805_v59 = vrot.slane %v804_v55, 1  ;;  %v797_v60 = vrot.slane %v796_v56, 1  ;;  %v810_v61 = vadd.f32 %v809_v57, %v808_v45 }
 0x2e6   :  { %v806_v62 = vadd.f32 %v805_v59, %v804_v55  ;;  %v813_v63 = vmul.f32 0.125, %v792_v58  ;;  %v798_v0 = vadd.f32 %v797_v60, %v796_v56  ;;  %v811_v1 = vrot.slane %v810_v61, 1 }
 0x2e8   :  { %v815_v2 = vmul.f32 0.125, %v806_v62  ;;  %v817_v3 = vmul.f32 %v813_v63, %v813_v63  ;;  %v812_v4 = vadd.f32 %v811_v1, %v810_v61  ;;  %v814_v5 = vmul.f32 0.125, %v798_v0 }
 0x2e9   :  { %v846_v24 = vsub.f32 %v776_v36, %v813_v63  ;;  %v1145_v36 = vld [vmem:[%s1575_s5] ss:$0 sm:$0xff] }
 0x2ea   :  { %v819_v6 = vsub.f32 %v815_v2, %v817_v3  ;;  %v816_v7 = vmul.f32 0.125, %v812_v4  ;;  %v818_v8 = vmul.f32 %v814_v5, %v814_v5  ;;  %v847_v25 = vsub.f32 %v778_v39, %v814_v5 }
 0x2ec   :  { %v821_v9 = vmax.f32 %v819_v6, 0.0  ;;  %v820_v10 = vsub.f32 %v816_v7, %v818_v8 }
 0x2ee   :  { %v823_v11 = vadd.f32 1e-05, %v821_v9  ;;  %v822_v12 = vmax.f32 %v820_v10, 0.0 }
 0x2f0   :  { %v824_v13 = vadd.f32 1e-05, %v822_v12  ;;  %1317 = vrsqrt.f32 %v823_v11 }
 0x2f2   :  { %1319 = vrsqrt.f32 %v824_v13 }
 0x2fd   :  { %v1318_v15 = vpop.eup %1317 }
 0x2ff   :  { %v1320_v16 = vpop.eup %1319 }
 0x300   :  { %v829_v18 = vcombine.low %v1318_v15, %v1320_v16 }
 0x302   :  { %v836_v19 = vrot.slane %v829_v18, %v1472_v26 }
 0x304   :  { %v843_v20 = vrot.slane %v836_v19, %v1472_v26 }
 0x306   :  { %v845_v21 = vmul.f32 %v1143_v14, %v843_v20 }
 0x308   :  { %v856_v27 = vrot.slane %v845_v21, %v1484_v34  ;;  %v852_v28 = vrot.slane %v845_v21, %v1482_v33 }
 0x30a   :  { %v860_v29 = vmul.f32 %v856_v27, %v847_v25  ;;  %v859_v30 = vmul.f32 %v852_v28, %v846_v24 }
 0x30c   :  { %v873_v31 = vadd.f32 %v869_v23, %v860_v29  ;;  %v872_v32 = vadd.f32 %v865_v22, %v859_v30 }
 0x30e   :  { %v875_v35 = vmax.f32 %v873_v31, 0.0  ;;  %v874_v37 = vmax.f32 %v872_v32, 0.0 }
 0x310   :  { %v877_v38 = vpack.c.bf16 %v875_v35, %v875_v35  ;;  %v876_v40 = vpack.c.bf16 %v874_v37, %v874_v37 }
 0x312   :  { %1045 = vmatprep.mubr.bf16.mxu1 %v877_v38 }
 0x313   :  { %1046 = vmatmul.mubr.bf16.vlgmr.msra.gmra.mxu1 %v876_v40 }
 0x3d3   :  { %v1178_v26 = vpop.f32.mrf.mxu1 }
 0x3d5   :  { %v1179_v39 = vpop.f32.mrf.mxu1 }
 0x3d6   :  { %v1180_v41 = vadd.f32 %v1179_v39, %v1178_v26 }
 0x3d7   :  { %v1181_v34 = vpop.f32.mrf.mxu1 }
 0x3d8   :  { %v1048_v33 = vadd.f32 %v1180_v41, %v1145_v36 }
 0x3d9   :  { %v1182_v43 = vpop.f32.mrf.mxu1 }
 0x3da   :  { %v1053_v44 = vmax.f32 %v1048_v33, 0.0 }
 0x3dc   :  { %1055 = vst.msk [vmem:[#allocation7] sm:$0xff] %vm1054_vm1, %v1053_v44 }
 0x3dd   :  { %1372 = shalt.err (!%p1369_p0)
}
 0x3de   :  { %1065 = dma.vmem_to_hbm [thread:$0]  %s1063_s18, 128, %s1578_s8, [#allocation4]  }
 0x3df   :  { %1385 = dma.done.wait [#allocation4], 128  }
 0x3e0   :  { %1386 = vsyncadd [#allocation4], 4294967168 }
 0x3e1   :  { %1069 = vsyncpa [#allocation3], 1 }
 0x3e2   :  { %1070 = vsyncpa [#allocation6], 1 }
 0x3e3   :  { %1071 = vsyncpa [#allocation4], 1 }

</bundles_post_ra>
